<compile_context>
chip_gen: v7x
topology: tpu7x:2x2x1
jax: 0.10.0
libtpu: 0.0.40
codegen_flags: <defaults>
</compile_context>

<pallas_src>
import jax
import jax.numpy as jnp
from jax.experimental import pallas as pl
from jax.experimental.pallas import tpu as pltpu


def leafparam_kernel(p_ref, o_ref):
    # p_ref: (1, C) parameter row, resident in VMEM across all grid steps.
    # o_ref: (TB, C) output tile.
    o_ref[...] = jnp.broadcast_to(p_ref[...], o_ref.shape)


def _pallas_broadcast(p_row, rows, cols):
    """Broadcast a (1, cols) row to (rows, cols) with a batch-tiled Pallas kernel."""
    dtype = p_row.dtype
    itemsize = jnp.dtype(dtype).itemsize

    # Cap the batch tile so one output tile is ~<= 8 MiB: double-buffered that
    # stays comfortably inside v7x's 64 MiB physical / 32 MiB scoped-default
    # VMEM, and >=512-row tiles already sit at ~85% of the HBM-write roofline.
    bytes_per_row = max(cols * itemsize, 1)
    tb_cap = max(8, min(2048, (8 << 20) // bytes_per_row))
    if rows <= tb_cap:
        tb = rows                        # single block == full array dims
    else:
        tb = max(8, (tb_cap // 8) * 8)   # keep sublane-aligned tiles

    grid = (pl.cdiv(rows, tb),)
    return pl.pallas_call(
        leafparam_kernel,
        out_shape=jax.ShapeDtypeStruct((rows, cols), dtype),
        grid=grid,
        in_specs=[pl.BlockSpec((1, cols), lambda i: (0, 0))],   # p stays resident
        out_specs=pl.BlockSpec((tb, cols), lambda i: (i, 0)),
        compiler_params=pltpu.CompilerParams(
            dimension_semantics=("parallel",)),   # megacore split on v7x
    )(p_row)


def leaf_param_forward(x, p, *, force_pallas=False, small_threshold=1 << 14):
    """Pallas equivalent of LeafParam.forward: ignore x's values, broadcast p
    to (x.shape[0], n). Only x's batch size is used; x is deliberately NOT
    passed to the pallas_call (the kernel is purely write-bound)."""
    B = x.shape[0]
    n = p.shape[1]

    # Tiny-output fast path: a plain XLA broadcast fuses into the consumer and
    # beats pallas_call fixed overhead by orders of magnitude.
    if not force_pallas and B * n <= small_threshold:
        return jnp.broadcast_to(p, (B, n))

    # Lane-dense repack: if n is a sub-multiple of 128 and the flat output is
    # 128-divisible, write through a (B*n/128, 128) view so every store is a
    # full-width (unmasked) vst instead of a masked partial store.
    if n < 128 and (128 % n == 0) and ((B * n) % 128 == 0):
        p_row = jnp.tile(p, (1, 128 // n))            # (1, 128)
        out = _pallas_broadcast(p_row, (B * n) // 128, 128)
        return out.reshape(B, n)                      # row-major, free

    return _pallas_broadcast(p, B, n)


if __name__ == "__main__":
    key = jax.random.PRNGKey(0)

    # Small shape consistent with the module: batch=2, hidden n=32.
    B, n = 2, 32
    x = jax.random.normal(key, (B, n), dtype=jnp.float32)   # values are ignored
    p = jnp.zeros((1, n), dtype=jnp.float32)                 # nn.Parameter(torch.zeros(1, n))

    ref_small = jnp.broadcast_to(p, (B, n))

    # 1) Run the Pallas kernel itself at the small shape (force past fast path).
    out_kernel = jax.block_until_ready(leaf_param_forward(x, p, force_pallas=True))
    assert out_kernel.shape == (B, n) and out_kernel.dtype == p.dtype
    assert jnp.array_equal(out_kernel, ref_small), "pallas kernel mismatch (small)"

    # 2) Default wrapper at the small shape (takes the jnp.broadcast_to fast path).
    out_default = jax.block_until_ready(leaf_param_forward(x, p))
    assert jnp.array_equal(out_default, ref_small), "fast-path mismatch"

    # 3) Larger shapes exercising the tiled + lane-dense kernel paths.
    key2, key3 = jax.random.split(key)

    Bl, nl = 1024, 32                                   # lane-dense repack path
    xl = jax.random.normal(key2, (Bl, nl), dtype=jnp.float32)
    p_l = jax.random.normal(key3, (1, nl), dtype=jnp.float32)
    out_l = jax.block_until_ready(leaf_param_forward(xl, p_l))
    assert jnp.array_equal(out_l, jnp.broadcast_to(p_l, (Bl, nl))), \
        "pallas kernel mismatch (lane-dense path)"

    Bw, nw = 512, 256                                   # already-lane-dense path
    xw = jax.random.normal(key2, (Bw, nw), dtype=jnp.float32)
    p_w = jax.random.normal(key3, (1, nw), dtype=jnp.float32)
    out_w = jax.block_until_ready(leaf_param_forward(xw, p_w))
    assert jnp.array_equal(out_w, jnp.broadcast_to(p_w, (Bw, nw))), \
        "pallas kernel mismatch (wide path)"

    print("KERNEL_OK")
</pallas_src>

<mosaic_0001>
module attributes {stable_mosaic.version = 11 : i64} {
  func.func @leafparam_kernel(%arg0: i32, %arg1: memref<1x32xf32, #tpu.memory_space<vmem>>, %arg2: memref<2x32xf32, #tpu.memory_space<vmem>>) attributes {dimension_semantics = [#tpu.dimension_semantics<parallel>], iteration_bounds = array<i64: 1>, scalar_prefetch = 0 : i64, scratch_operands = 0 : i64, tpu.core_type = #tpu.core_type<tc>, window_params = [{pipeline_mode = #tpu.pipeline_mode<synchronous>, transform_indices = @transform_0, window_bounds = array<i64: 1, 32>}, {transform_indices = @transform_1, window_bounds = array<i64: 2, 32>}]} {
    %c0 = arith.constant 0 : index
    %c0_0 = arith.constant 0 : index
    %0 = vector.load %arg1[%c0, %c0_0] : memref<1x32xf32, #tpu.memory_space<vmem>>, vector<1x32xf32>
    %1 = vector.shape_cast %0 : vector<1x32xf32> to vector<1x32xf32>
    %2 = vector.broadcast %1 : vector<1x32xf32> to vector<2x32xf32>
    %c0_1 = arith.constant 0 : index
    %c0_2 = arith.constant 0 : index
    %3 = vector.load %arg2[%c0_1, %c0_2] : memref<2x32xf32, #tpu.memory_space<vmem>>, vector<2x32xf32>
    tpu.vector_store %arg2[%c0_1, %c0_2], %2 {strides = array<i32>} : memref<2x32xf32, #tpu.memory_space<vmem>>, vector<2x32xf32>,
    return
  }
  func.func @transform_0(%arg0: i32) -> (i32, i32) {
    %c0_i32 = arith.constant 0 : i32
    %c0_i32_0 = arith.constant 0 : i32
    %c0_i32_1 = arith.constant 0 : i32
    return %c0_i32, %c0_i32_0 : i32, i32
  }
  func.func @transform_1(%arg0: i32) -> (i32, i32) {
    %c0_i32 = arith.constant 0 : i32
    %c0_i32_0 = arith.constant 0 : i32
    return %arg0, %c0_i32 : i32, i32
  }
}

</mosaic_0001>

<bundles_post_ra>
// kernel: tpu_custom_call.1
= control target key start
LH: loop header
LB: loop body
LE: loop exit
PB: predicated region body
PF: predicated region fallthrough
CT: control target
= control target key end

     0   :  { %6 = vsyncpa [#allocation3], 0  ;;  %s132_s0 = inlined_call_operand.hbm [shape: f32[1,32], index: 0, kind: input, shape index: {}]   ;;  %s133_s1 = inlined_call_operand.hbm [shape: f32[2,32], index: 1, kind: output, shape index: {}]  }
   0x1   :  { %7 = vsyncpa [#allocation4], 0  ;;  %s96_s6 = smov [#allocation2]   ;;  %s48_s10 = scalar_lea.hbm %s132_s0, 16 }
   0x2   :  { %s14_s7 = sshll.u32 %s96_s6, 4  ;;  %p49_p0 = scmp.ne.s32.totalorder %s132_s0, %s48_s10  ;;  %s15_s7 = int_to_ptr.vmem [resolvable:$true] %s14_s7 }
   0x3   :  { %p52_p1 = scmp.lt.u32.totalorder %s48_s10, %s132_s0 }
   0x5   :  { %p54_p2 = pnand %p52_p1, %p49_p0 }
   0x7   :  { %57 = shalt.err (!%p54_p2)
}
   0x8   :  { %s58_s15 = scalar_lea.vmem %s15_s7, 16  ;;  %s62_s16 = scalar_lea.vmem %s15_s7, 32 }
   0x9   :  { %p59_p3 = scmp.ne.s32.totalorder %s15_s7, %s58_s15  ;;  %p63_p4 = scmp.lt.s32.totalorder %s15_s7, %s15_s7 }
   0xa   :  { %p64_p5 = scmp.lt.s32.totalorder %s62_s16, %s58_s15 }
   0xc   :  { %p65_p6 = por %p64_p5, %p63_p4 }
   0xe   :  { %p66_p7 = pnand %p65_p6, %p59_p3 }
  0x10   :  { %69 = shalt.err (!%p66_p7)
}
  0x11   :  { %17 = dma.hbm_to_vmem [thread:$0]  %s132_s0, 16, %s15_s7, [#allocation3]  }
  0x12   :  { %92 = dma.done.wait [#allocation3], 16  }
  0x13   :  { %93 = vsyncadd [#allocation3], 4294967280  ;;  %s97_s19 = smov [#allocation5]   ;;  %vm28_vm0 = vcmask 254976   ;;  %v45_v0 = vld [vmem:[#allocation2] ss:$0 sm:$0xff] }
  0x14   :  { %s36_s20 = sshll.u32 %s97_s19, 4  ;;  %29 = vst.msk [vmem:[#allocation5] sm:$0x3] %vm28_vm0, %v45_v0  ;;  %s37_s20 = int_to_ptr.vmem [resolvable:$true] %s36_s20 }
  0x15   :  { %s70_s21 = scalar_lea.vmem %s37_s20, 32  ;;  %p75_p9 = scmp.lt.s32.totalorder %s37_s20, %s37_s20 }
  0x16   :  { %p71_p8 = scmp.ne.s32.totalorder %s37_s20, %s70_s21  ;;  %p76_p10 = scmp.lt.s32.totalorder %s70_s21, %s70_s21 }
  0x18   :  { %p77_p11 = por %p76_p10, %p75_p9 }
  0x1a   :  { %p78_p12 = pnand %p77_p11, %p71_p8 }
  0x1c   :  { %81 = shalt.err (!%p78_p12)
}
  0x1d   :  { %s82_s24 = scalar_lea.hbm %s133_s1, 32 }
  0x1e   :  { %p83_p13 = scmp.ne.s32.totalorder %s133_s1, %s82_s24  ;;  %p86_p0 = scmp.lt.u32.totalorder %s82_s24, %s133_s1 }
  0x20   :  { %p88_p1 = pnand %p86_p0, %p83_p13 }
  0x22   :  { %91 = shalt.err (!%p88_p1)
}
  0x23   :  { %39 = dma.vmem_to_hbm [thread:$0]  %s37_s20, 32, %s133_s1, [#allocation4]  }
  0x24   :  { %94 = dma.done.wait [#allocation4], 32  }
  0x25   :  { %95 = vsyncadd [#allocation4], 4294967264 }
  0x26   :  { %43 = vsyncpa [#allocation3], 1 }
  0x27   :  { %44 = vsyncpa [#allocation4], 1 }

</bundles_post_ra>
